<compile_context>
chip_gen: v6e
topology: v6e:2x2x1
jax: 0.10.0
libtpu: 0.0.40
codegen_flags: <defaults>
</compile_context>

<pallas_src>
import jax
import jax.numpy as jnp
from jax.experimental import pallas as pl
from jax.experimental.pallas import tpu as pltpu

_EPS = 1e-5
_HIGHEST = jax.lax.Precision.HIGHEST  # reference only


def resnet_block_kernel(sc_ref, ml_ref, mr_ref,
                        s1_ref, t1_ref, w1_ref, b1_ref,
                        s2_ref, t2_ref, w2_ref, b2_ref, o_ref):
    nb, C, Lp = o_ref.shape

    # boundary masks (1, Lp), constant across grid steps (DMA'd once)
    keep_left = ml_ref[...] != 0.0      # lane l-1 exists
    keep_right = mr_ref[...] != 0.0     # lane l+1 exists

    w1 = w1_ref[...]
    w2 = w2_ref[...]
    s1 = s1_ref[...]
    t1 = t1_ref[...]
    b1 = b1_ref[...]
    s2 = s2_ref[...]
    t2 = t2_ref[...]
    b2 = b2_ref[...]

    def bn_relu_conv(h, s, t, w, b):
        # folded eval-mode BatchNorm1d + ReLU (f32 on the VPU)
        h = jnp.maximum(h * s + t, 0.0)
        # Conv1d(C, C, k=3, padding=1): one stacked (3C, C) x (C, Lp) MXU matmul
        # (bf16 operands, f32 accumulation), taps recombined with XLU rolls.
        y = jnp.dot(w, h.astype(jnp.bfloat16),
                    preferred_element_type=jnp.float32)          # (3C, Lp)
        y0 = y[0:C]          # tap k=0 -> contributes at l from h[l-1]
        y1 = y[C:2 * C]      # tap k=1 -> contributes at l from h[l]
        y2 = y[2 * C:3 * C]  # tap k=2 -> contributes at l from h[l+1]
        left = jnp.where(keep_left, pltpu.roll(y0, shift=1, axis=1), 0.0)
        right = jnp.where(keep_right, pltpu.roll(y2, shift=Lp - 1, axis=1), 0.0)
        return left + y1 + right + b

    # nb is kept small by _pick_batch_block, so a static unroll is fine here.
    for bi in range(nb):
        shortcut = sc_ref[bi]                                    # (C, Lp) f32
        h = bn_relu_conv(shortcut, s1, t1, w1, b1)
        h = bn_relu_conv(h, s2, t2, w2, b2)
        o_ref[bi] = (h + shortcut).astype(o_ref.dtype)


def _vmem_limit_bytes():
    """Generation-aware VMEM limit: ~3/4 of physical, always leaving headroom."""
    cap = 64 * 1024 * 1024
    try:
        cap = int(pltpu.get_tpu_info().vmem_capacity_bytes)
    except Exception:
        pass  # conservative default (works on v5e/v6e/v7x)
    return max(32 * 1024 * 1024, min((cap * 3) // 4, cap - 16 * 1024 * 1024))


def _pick_batch_block(N, C, Lp, budget_bytes):
    """Batch-block size nb (a divisor of N) such that the rough per-step live VMEM
    footprint fits the budget, with >= 2 grid steps whenever N >= 2 (pipelining and
    v7x's two TensorCores), and a small cap so the in-kernel unroll stays bounded."""
    per_batch = max(32 * C * Lp, 1)          # ~bytes of live f32 state per batch elem
    max_nb = max(1, min(N, budget_bytes // per_batch))
    if N >= 2:
        max_nb = min(max_nb, max(1, N // 2))  # guarantee >= 2 grid steps
    max_nb = min(max_nb, 8)
    nb = 1
    for d in range(1, max_nb + 1):
        if N % d == 0:
            nb = d
    return nb


def resnet_block(x, kparams):
    """x: (N, C, L) float32, L even.  kparams: folded params from fold_params()."""
    N, C, L = x.shape
    assert L % 2 == 0, "kernel assumes even L (PyTorch output length differs for odd L)"
    Lp = L // 2

    # ---- shortcut: ConstantPad1d((0,1), 0) + MaxPool1d(kernel=3, stride=2) ----
    # One fused XLA pass over x (slices + max); everything downstream is the kernel.
    x0 = x[:, :, 0::2]                                            # x[:, :, 2i]
    x1 = x[:, :, 1::2]                                            # x[:, :, 2i+1]
    x2 = jnp.pad(x[:, :, 2::2], ((0, 0), (0, 0), (0, 1)))         # x[:, :, 2i+2] (0 pad)
    shortcut = jnp.maximum(jnp.maximum(x0, x1), x2)               # (N, C, Lp) f32

    # boundary masks over the lane (Lp) axis — true constants, DMA'd once
    pos = jnp.arange(Lp, dtype=jnp.float32)
    m_left = (pos > 0).astype(jnp.float32).reshape(1, Lp)
    m_right = (pos < Lp - 1).astype(jnp.float32).reshape(1, Lp)

    vmem_limit = _vmem_limit_bytes()
    nb = _pick_batch_block(N, C, Lp, budget_bytes=vmem_limit // 2)
    num_blocks = N // nb

    s1, t1, w1, b1, s2, t2, w2, b2 = kparams

    def const_spec(a):
        return pl.BlockSpec(a.shape, lambda i: (0, 0))

    act_spec = pl.BlockSpec((nb, C, Lp), lambda i: (i, 0, 0))

    grid_spec = pltpu.PrefetchScalarGridSpec(
        num_scalar_prefetch=0,
        grid=(num_blocks,),
        in_specs=[act_spec,
                  const_spec(m_left), const_spec(m_right),
                  const_spec(s1), const_spec(t1), const_spec(w1), const_spec(b1),
                  const_spec(s2), const_spec(t2), const_spec(w2), const_spec(b2)],
        out_specs=pl.BlockSpec((nb, C, Lp), lambda i: (i, 0, 0)),
    )
    return pl.pallas_call(
        resnet_block_kernel,
        out_shape=jax.ShapeDtypeStruct((N, C, Lp), jnp.float32),
        grid_spec=grid_spec,
        compiler_params=pltpu.CompilerParams(
            dimension_semantics=("parallel",),
            vmem_limit_bytes=vmem_limit,
        ),
    )(shortcut, m_left, m_right, s1, t1, w1, b1, s2, t2, w2, b2)


def fold_params(raw):
    """Fold eval-mode BN into per-channel affine; stack conv taps into (3C, C) bf16."""
    g1, be1, mu1, v1, w1, b1, g2, be2, mu2, v2, w2, b2 = raw
    C = w1.shape[0]

    def bn_affine(g, be, mu, v):
        s = g / jnp.sqrt(v + _EPS)
        return s.reshape(C, 1), (be - mu * s).reshape(C, 1)

    def conv_weight(w):   # (C_out, C_in, 3) -> (3*C_out, C_in); rows [k*C + o] = w[o, :, k]
        return jnp.transpose(w, (2, 0, 1)).reshape(3 * C, C).astype(jnp.bfloat16)

    s1, t1 = bn_affine(g1, be1, mu1, v1)
    s2, t2 = bn_affine(g2, be2, mu2, v2)
    return (s1, t1, conv_weight(w1), b1.reshape(C, 1),
            s2, t2, conv_weight(w2), b2.reshape(C, 1))


def reference(x, raw):
    """Plain-JAX reference of the PyTorch forward (eval-mode BN)."""
    g1, be1, mu1, v1, w1, b1, g2, be2, mu2, v2, w2, b2 = raw
    N, C, L = x.shape
    Lp = L // 2
    xp = jnp.pad(x, ((0, 0), (0, 0), (0, 1)))
    windows = jnp.stack([xp[:, :, i:i + 2 * Lp:2] for i in range(3)], axis=0)
    shortcut = jnp.max(windows, axis=0)

    def bn(h, g, be, mu, v):
        return ((h - mu[None, :, None]) / jnp.sqrt(v[None, :, None] + _EPS)
                * g[None, :, None] + be[None, :, None])

    def conv(h, w, b):
        out = jax.lax.conv_general_dilated(h, w, window_strides=(1,), padding=((1, 1),),
                                           dimension_numbers=("NCH", "OIH", "NCH"),
                                           precision=_HIGHEST)
        return out + b[None, :, None]

    h = conv(jax.nn.relu(bn(shortcut, g1, be1, mu1, v1)), w1, b1)
    h = conv(jax.nn.relu(bn(h, g2, be2, mu2, v2)), w2, b2)
    return h + shortcut


if __name__ == "__main__":
    N, C, L = 2, 4, 16
    key = jax.random.PRNGKey(0)
    ks = jax.random.split(key, 13)

    # deterministic synthetic parameters (BN1 -> Conv1 -> BN2 -> Conv2)
    g1 = 1.0 + 0.1 * jax.random.normal(ks[0], (C,), jnp.float32)
    be1 = 0.1 * jax.random.normal(ks[1], (C,), jnp.float32)
    mu1 = 0.1 * jax.random.normal(ks[2], (C,), jnp.float32)
    v1 = jax.random.uniform(ks[3], (C,), jnp.float32, minval=0.5, maxval=1.5)
    w1 = 0.3 * jax.random.normal(ks[4], (C, C, 3), jnp.float32)   # (out, in, k)
    b1 = 0.1 * jax.random.normal(ks[5], (C,), jnp.float32)
    g2 = 1.0 + 0.1 * jax.random.normal(ks[6], (C,), jnp.float32)
    be2 = 0.1 * jax.random.normal(ks[7], (C,), jnp.float32)
    mu2 = 0.1 * jax.random.normal(ks[8], (C,), jnp.float32)
    v2 = jax.random.uniform(ks[9], (C,), jnp.float32, minval=0.5, maxval=1.5)
    w2 = 0.3 * jax.random.normal(ks[10], (C, C, 3), jnp.float32)
    b2 = 0.1 * jax.random.normal(ks[11], (C,), jnp.float32)

    x = jax.random.normal(ks[12], (N, C, L), jnp.float32)

    raw = (g1, be1, mu1, v1, w1, b1, g2, be2, mu2, v2, w2, b2)
    kparams = fold_params(raw)

    out = resnet_block(x, kparams)
    out = jax.block_until_ready(out)

    ref = reference(x, raw)
    assert out.shape == (N, C, L // 2), out.shape
    # bf16 matmul operands with f32 accumulation -> slightly looser tolerance
    assert jnp.allclose(out, ref, atol=5e-2, rtol=5e-2), \
        f"max abs diff {jnp.max(jnp.abs(out - ref))}"

    print("KERNEL_OK")
</pallas_src>

<mosaic_0001>
module attributes {stable_mosaic.version = 11 : i64} {
  func.func @resnet_block_kernel(%arg0: i32, %arg1: memref<1x4x8xf32, #tpu.memory_space<vmem>>, %arg2: memref<1x8xf32, #tpu.memory_space<vmem>>, %arg3: memref<1x8xf32, #tpu.memory_space<vmem>>, %arg4: memref<4x1xf32, #tpu.memory_space<vmem>>, %arg5: memref<4x1xf32, #tpu.memory_space<vmem>>, %arg6: memref<12x4xbf16, #tpu.memory_space<vmem>>, %arg7: memref<4x1xf32, #tpu.memory_space<vmem>>, %arg8: memref<4x1xf32, #tpu.memory_space<vmem>>, %arg9: memref<4x1xf32, #tpu.memory_space<vmem>>, %arg10: memref<12x4xbf16, #tpu.memory_space<vmem>>, %arg11: memref<4x1xf32, #tpu.memory_space<vmem>>, %arg12: memref<1x4x8xf32, #tpu.memory_space<vmem>>) attributes {dimension_semantics = [#tpu.dimension_semantics<parallel>], iteration_bounds = array<i64: 2>, scalar_prefetch = 0 : i64, scratch_operands = 0 : i64, tpu.core_type = #tpu.core_type<tc>, window_params = [{transform_indices = @transform_0, window_bounds = array<i64: 1, 4, 8>}, {pipeline_mode = #tpu.pipeline_mode<synchronous>, transform_indices = @transform_1, window_bounds = array<i64: 1, 8>}, {pipeline_mode = #tpu.pipeline_mode<synchronous>, transform_indices = @transform_2, window_bounds = array<i64: 1, 8>}, {pipeline_mode = #tpu.pipeline_mode<synchronous>, transform_indices = @transform_3, window_bounds = array<i64: 4, 1>}, {pipeline_mode = #tpu.pipeline_mode<synchronous>, transform_indices = @transform_4, window_bounds = array<i64: 4, 1>}, {pipeline_mode = #tpu.pipeline_mode<synchronous>, transform_indices = @transform_5, window_bounds = array<i64: 12, 4>}, {pipeline_mode = #tpu.pipeline_mode<synchronous>, transform_indices = @transform_6, window_bounds = array<i64: 4, 1>}, {pipeline_mode = #tpu.pipeline_mode<synchronous>, transform_indices = @transform_7, window_bounds = array<i64: 4, 1>}, {pipeline_mode = #tpu.pipeline_mode<synchronous>, transform_indices = @transform_8, window_bounds = array<i64: 4, 1>}, {pipeline_mode = #tpu.pipeline_mode<synchronous>, transform_indices = @transform_9, window_bounds = array<i64: 12, 4>}, {pipeline_mode = #tpu.pipeline_mode<synchronous>, transform_indices = @transform_10, window_bounds = array<i64: 4, 1>}, {transform_indices = @transform_11, window_bounds = array<i64: 1, 4, 8>}]} {
    %c0 = arith.constant 0 : index
    %c0_0 = arith.constant 0 : index
    %0 = vector.load %arg2[%c0, %c0_0] : memref<1x8xf32, #tpu.memory_space<vmem>>, vector<1x8xf32>
    %cst = arith.constant 0.000000e+00 : f32
    %1 = vector.broadcast %cst : f32 to vector<1x8xf32>
    %2 = arith.cmpf one, %0, %1 : vector<1x8xf32>
    %c0_1 = arith.constant 0 : index
    %c0_2 = arith.constant 0 : index
    %3 = vector.load %arg3[%c0_1, %c0_2] : memref<1x8xf32, #tpu.memory_space<vmem>>, vector<1x8xf32>
    %cst_3 = arith.constant 0.000000e+00 : f32
    %4 = vector.broadcast %cst_3 : f32 to vector<1x8xf32>
    %5 = arith.cmpf one, %3, %4 : vector<1x8xf32>
    %c0_4 = arith.constant 0 : index
    %c0_5 = arith.constant 0 : index
    %6 = vector.load %arg6[%c0_4, %c0_5] : memref<12x4xbf16, #tpu.memory_space<vmem>>, vector<12x4xbf16>
    %c0_6 = arith.constant 0 : index
    %c0_7 = arith.constant 0 : index
    %7 = vector.load %arg10[%c0_6, %c0_7] : memref<12x4xbf16, #tpu.memory_space<vmem>>, vector<12x4xbf16>
    %c0_8 = arith.constant 0 : index
    %c0_9 = arith.constant 0 : index
    %8 = vector.load %arg4[%c0_8, %c0_9] : memref<4x1xf32, #tpu.memory_space<vmem>>, vector<4x1xf32>
    %c0_10 = arith.constant 0 : index
    %c0_11 = arith.constant 0 : index
    %9 = vector.load %arg5[%c0_10, %c0_11] : memref<4x1xf32, #tpu.memory_space<vmem>>, vector<4x1xf32>
    %c0_12 = arith.constant 0 : index
    %c0_13 = arith.constant 0 : index
    %10 = vector.load %arg7[%c0_12, %c0_13] : memref<4x1xf32, #tpu.memory_space<vmem>>, vector<4x1xf32>
    %c0_14 = arith.constant 0 : index
    %c0_15 = arith.constant 0 : index
    %11 = vector.load %arg8[%c0_14, %c0_15] : memref<4x1xf32, #tpu.memory_space<vmem>>, vector<4x1xf32>
    %c0_16 = arith.constant 0 : index
    %c0_17 = arith.constant 0 : index
    %12 = vector.load %arg9[%c0_16, %c0_17] : memref<4x1xf32, #tpu.memory_space<vmem>>, vector<4x1xf32>
    %c0_18 = arith.constant 0 : index
    %c0_19 = arith.constant 0 : index
    %13 = vector.load %arg11[%c0_18, %c0_19] : memref<4x1xf32, #tpu.memory_space<vmem>>, vector<4x1xf32>
    %c0_20 = arith.constant 0 : index
    %c0_21 = arith.constant 0 : index
    %c0_22 = arith.constant 0 : index
    %14 = vector.load %arg1[%c0_20, %c0_21, %c0_22] : memref<1x4x8xf32, #tpu.memory_space<vmem>>, vector<1x4x8xf32>
    %15 = vector.shape_cast %14 : vector<1x4x8xf32> to vector<4x8xf32>
    %16 = vector.broadcast %8 : vector<4x1xf32> to vector<4x8xf32>
    %17 = arith.mulf %15, %16 : vector<4x8xf32>
    %18 = vector.broadcast %9 : vector<4x1xf32> to vector<4x8xf32>
    %19 = arith.addf %17, %18 : vector<4x8xf32>
    %cst_23 = arith.constant 0.000000e+00 : f32
    %20 = vector.broadcast %cst_23 : f32 to vector<4x8xf32>
    %21 = arith.maximumf %19, %20 : vector<4x8xf32>
    %22 = arith.truncf %21 : vector<4x8xf32> to vector<4x8xbf16>
    %cst_24 = arith.constant dense<0.000000e+00> : vector<12x8xf32>
    %23 = tpu.matmul %6, %22, %cst_24 {dimension_numbers = #tpu.dot_dimension_numbers<[1], [0], [0], [1], [0, 0, 1, 1], [], []>} : vector<12x4xbf16>, vector<4x8xbf16>, vector<12x8xf32> -> vector<12x8xf32>
    %24 = vector.extract_strided_slice %23 {offsets = [0, 0], sizes = [4, 8], strides = [1, 1]} : vector<12x8xf32> to vector<4x8xf32>
    %25 = vector.extract_strided_slice %23 {offsets = [4, 0], sizes = [4, 8], strides = [1, 1]} : vector<12x8xf32> to vector<4x8xf32>
    %26 = vector.extract_strided_slice %23 {offsets = [8, 0], sizes = [4, 8], strides = [1, 1]} : vector<12x8xf32> to vector<4x8xf32>
    %c1_i32 = arith.constant 1 : i32
    %27 = tpu.dynamic_rotate %24 by %c1_i32 dim 1 : vector<4x8xf32>, i32 -> vector<4x8xf32>
    %cst_25 = arith.constant 0.000000e+00 : f32
    %28 = vector.shape_cast %2 : vector<1x8xi1> to vector<1x8xi1>
    %29 = vector.broadcast %28 : vector<1x8xi1> to vector<4x8xi1>
    %30 = vector.broadcast %cst_25 : f32 to vector<4x8xf32>
    %31 = arith.select %29, %27, %30 : vector<4x8xi1>, vector<4x8xf32>
    %c7_i32 = arith.constant 7 : i32
    %32 = tpu.dynamic_rotate %26 by %c7_i32 dim 1 : vector<4x8xf32>, i32 -> vector<4x8xf32>
    %cst_26 = arith.constant 0.000000e+00 : f32
    %33 = vector.shape_cast %5 : vector<1x8xi1> to vector<1x8xi1>
    %34 = vector.broadcast %33 : vector<1x8xi1> to vector<4x8xi1>
    %35 = vector.broadcast %cst_26 : f32 to vector<4x8xf32>
    %36 = arith.select %34, %32, %35 : vector<4x8xi1>, vector<4x8xf32>
    %37 = arith.addf %31, %25 : vector<4x8xf32>
    %38 = arith.addf %37, %36 : vector<4x8xf32>
    %39 = vector.broadcast %10 : vector<4x1xf32> to vector<4x8xf32>
    %40 = arith.addf %38, %39 : vector<4x8xf32>
    %41 = vector.broadcast %11 : vector<4x1xf32> to vector<4x8xf32>
    %42 = arith.mulf %40, %41 : vector<4x8xf32>
    %43 = vector.broadcast %12 : vector<4x1xf32> to vector<4x8xf32>
    %44 = arith.addf %42, %43 : vector<4x8xf32>
    %cst_27 = arith.constant 0.000000e+00 : f32
    %45 = vector.broadcast %cst_27 : f32 to vector<4x8xf32>
    %46 = arith.maximumf %44, %45 : vector<4x8xf32>
    %47 = arith.truncf %46 : vector<4x8xf32> to vector<4x8xbf16>
    %cst_28 = arith.constant dense<0.000000e+00> : vector<12x8xf32>
    %48 = tpu.matmul %7, %47, %cst_28 {dimension_numbers = #tpu.dot_dimension_numbers<[1], [0], [0], [1], [0, 0, 1, 1], [], []>} : vector<12x4xbf16>, vector<4x8xbf16>, vector<12x8xf32> -> vector<12x8xf32>
    %49 = vector.extract_strided_slice %48 {offsets = [0, 0], sizes = [4, 8], strides = [1, 1]} : vector<12x8xf32> to vector<4x8xf32>
    %50 = vector.extract_strided_slice %48 {offsets = [4, 0], sizes = [4, 8], strides = [1, 1]} : vector<12x8xf32> to vector<4x8xf32>
    %51 = vector.extract_strided_slice %48 {offsets = [8, 0], sizes = [4, 8], strides = [1, 1]} : vector<12x8xf32> to vector<4x8xf32>
    %c1_i32_29 = arith.constant 1 : i32
    %52 = tpu.dynamic_rotate %49 by %c1_i32_29 dim 1 : vector<4x8xf32>, i32 -> vector<4x8xf32>
    %cst_30 = arith.constant 0.000000e+00 : f32
    %53 = vector.shape_cast %2 : vector<1x8xi1> to vector<1x8xi1>
    %54 = vector.broadcast %53 : vector<1x8xi1> to vector<4x8xi1>
    %55 = vector.broadcast %cst_30 : f32 to vector<4x8xf32>
    %56 = arith.select %54, %52, %55 : vector<4x8xi1>, vector<4x8xf32>
    %c7_i32_31 = arith.constant 7 : i32
    %57 = tpu.dynamic_rotate %51 by %c7_i32_31 dim 1 : vector<4x8xf32>, i32 -> vector<4x8xf32>
    %cst_32 = arith.constant 0.000000e+00 : f32
    %58 = vector.shape_cast %5 : vector<1x8xi1> to vector<1x8xi1>
    %59 = vector.broadcast %58 : vector<1x8xi1> to vector<4x8xi1>
    %60 = vector.broadcast %cst_32 : f32 to vector<4x8xf32>
    %61 = arith.select %59, %57, %60 : vector<4x8xi1>, vector<4x8xf32>
    %62 = arith.addf %56, %50 : vector<4x8xf32>
    %63 = arith.addf %62, %61 : vector<4x8xf32>
    %64 = vector.broadcast %13 : vector<4x1xf32> to vector<4x8xf32>
    %65 = arith.addf %63, %64 : vector<4x8xf32>
    %66 = arith.addf %65, %15 : vector<4x8xf32>
    %c0_33 = arith.constant 0 : index
    %c0_34 = arith.constant 0 : index
    %c0_35 = arith.constant 0 : index
    %67 = vector.load %arg12[%c0_33, %c0_34, %c0_35] : memref<1x4x8xf32, #tpu.memory_space<vmem>>, vector<1x4x8xf32>
    %68 = vector.shape_cast %67 : vector<1x4x8xf32> to vector<4x8xf32>
    %69 = vector.shape_cast %66 : vector<4x8xf32> to vector<1x4x8xf32>
    tpu.vector_store %arg12[%c0_33, %c0_34, %c0_35], %69 {strides = array<i32>} : memref<1x4x8xf32, #tpu.memory_space<vmem>>, vector<1x4x8xf32>,
    return
  }
  func.func @transform_0(%arg0: i32) -> (i32, i32, i32) {
    %c0_i32 = arith.constant 0 : i32
    %c0_i32_0 = arith.constant 0 : i32
    %c0_i32_1 = arith.constant 0 : i32
    return %arg0, %c0_i32, %c0_i32_0 : i32, i32, i32
  }
  func.func @transform_1(%arg0: i32) -> (i32, i32) {
    %c0_i32 = arith.constant 0 : i32
    %c0_i32_0 = arith.constant 0 : i32
    %c0_i32_1 = arith.constant 0 : i32
    return %c0_i32, %c0_i32_0 : i32, i32
  }
  func.func @transform_2(%arg0: i32) -> (i32, i32) {
    %c0_i32 = arith.constant 0 : i32
    %c0_i32_0 = arith.constant 0 : i32
    %c0_i32_1 = arith.constant 0 : i32
    return %c0_i32, %c0_i32_0 : i32, i32
  }
  func.func @transform_3(%arg0: i32) -> (i32, i32) {
    %c0_i32 = arith.constant 0 : i32
    %c0_i32_0 = arith.constant 0 : i32
    %c0_i32_1 = arith.constant 0 : i32
    return %c0_i32, %c0_i32_0 : i32, i32
  }
  func.func @transform_4(%arg0: i32) -> (i32, i32) {
    %c0_i32 = arith.constant 0 : i32
    %c0_i32_0 = arith.constant 0 : i32
    %c0_i32_1 = arith.constant 0 : i32
    return %c0_i32, %c0_i32_0 : i32, i32
  }
  func.func @transform_5(%arg0: i32) -> (i32, i32) {
    %c0_i32 = arith.constant 0 : i32
    %c0_i32_0 = arith.constant 0 : i32
    %c0_i32_1 = arith.constant 0 : i32
    return %c0_i32, %c0_i32_0 : i32, i32
  }
  func.func @transform_6(%arg0: i32) -> (i32, i32) {
    %c0_i32 = arith.constant 0 : i32
    %c0_i32_0 = arith.constant 0 : i32
    %c0_i32_1 = arith.constant 0 : i32
    return %c0_i32, %c0_i32_0 : i32, i32
  }
  func.func @transform_7(%arg0: i32) -> (i32, i32) {
    %c0_i32 = arith.constant 0 : i32
    %c0_i32_0 = arith.constant 0 : i32
    %c0_i32_1 = arith.constant 0 : i32
    return %c0_i32, %c0_i32_0 : i32, i32
  }
  func.func @transform_8(%arg0: i32) -> (i32, i32) {
    %c0_i32 = arith.constant 0 : i32
    %c0_i32_0 = arith.constant 0 : i32
    %c0_i32_1 = arith.constant 0 : i32
    return %c0_i32, %c0_i32_0 : i32, i32
  }
  func.func @transform_9(%arg0: i32) -> (i32, i32) {
    %c0_i32 = arith.constant 0 : i32
    %c0_i32_0 = arith.constant 0 : i32
    %c0_i32_1 = arith.constant 0 : i32
    return %c0_i32, %c0_i32_0 : i32, i32
  }
  func.func @transform_10(%arg0: i32) -> (i32, i32) {
    %c0_i32 = arith.constant 0 : i32
    %c0_i32_0 = arith.constant 0 : i32
    %c0_i32_1 = arith.constant 0 : i32
    return %c0_i32, %c0_i32_0 : i32, i32
  }
  func.func @transform_11(%arg0: i32) -> (i32, i32, i32) {
    %c0_i32 = arith.constant 0 : i32
    %c0_i32_0 = arith.constant 0 : i32
    %c0_i32_1 = arith.constant 0 : i32
    return %arg0, %c0_i32, %c0_i32_0 : i32, i32, i32
  }
}

</mosaic_0001>

<bundles_post_ra>
// kernel: tpu_custom_call.1
= control target key start
LH: loop header
LB: loop body
LE: loop exit
PB: predicated region body
PF: predicated region fallthrough
CT: control target
= control target key end

     0   :  { %s1048_s0 = inlined_call_operand.vmem [shape: f32[2,4,8], index: 0, kind: input, shape index: {}]   ;;  %s1049_s1 = inlined_call_operand.vmem [shape: f32[1,8], index: 1, kind: input, shape index: {}]   ;;  %s1050_s2 = inlined_call_operand.vmem [shape: f32[1,8], index: 2, kind: input, shape index: {}]   ;;  %s1051_s3 = inlined_call_operand.vmem [shape: f32[4,1], index: 3, kind: input, shape index: {}]   ;;  %s1052_s4 = inlined_call_operand.vmem [shape: f32[4,1], index: 4, kind: input, shape index: {}]   ;;  %s1053_s5 = inlined_call_operand.vmem [shape: bf16[12,4], index: 5, kind: input, shape index: {}]   ;;  %s1054_s6 = inlined_call_operand.vmem [shape: f32[4,1], index: 6, kind: input, shape index: {}]   ;;  %s1055_s7 = inlined_call_operand.vmem [shape: f32[4,1], index: 7, kind: input, shape index: {}]   ;;  %s1056_s8 = inlined_call_operand.vmem [shape: f32[4,1], index: 8, kind: input, shape index: {}]   ;;  %s1057_s9 = inlined_call_operand.vmem [shape: bf16[12,4], index: 9, kind: input, shape index: {}]   ;;  %s1058_s10 = inlined_call_operand.vmem [shape: f32[4,1], index: 10, kind: input, shape index: {}]   ;;  %s1059_s11 = inlined_call_operand.hbm [shape: f32[2,4,8], index: 11, kind: output, shape index: {}]  }
   0x1   :  { %1060 = sst [smem:[#allocation5_spill]] %s1048_s0 }
   0x2   :  { %1061 = sst [smem:[#allocation6_spill]] %s1049_s1 }
   0x3   :  { %16 = vsyncpa [#allocation3], 0 }
   0x4   :  { %18 = vsyncpa [#allocation3 + $0x1], 0  ;;  %s895_s17 = smov 0   ;;  %s897_s18 = smov 0  }
   0x5   :  { %s899_s19 = smov 0   ;;  %s901_s20 = smov 0  }
   0x6 LB: > { %s916_s21 = sadd.s32 4294967295, %s826_s20   ;;  %s687_s22 = sadd.s32 4294967294, %s826_s20   ;;  %s826_s20 = sphi %s901_s20, %s1069_s20   ;;  %s822_s19 = sphi %s899_s19, %s1068_s19   ;;  %s818_s18 = sphi %s897_s18, %s1067_s18   ;;  %s814_s17 = sphi %s895_s17, %s1066_s17  }
   0x7   : > { %s920_s23 = sadd.s32 1, %s826_s20   ;;  %s267_s24 = sadd.s32 1, %s822_s19 }
   0x8   : > { %s264_s25 = ssub.s32 %s826_s20, %s920_s23  ;;  %p277_p0 = scmp.ne.s32.totalorder %s822_s19, %s818_s18 }
   0x9   : > { %p265_p1 = scmp.eq.s32.totalorder %s264_s25, 0  ;;  %p278_p2 = scmp.eq.s32.totalorder %s916_s21, 1 }
   0xa   : > { %p283_p3 = scmp.ne.s32.totalorder %s818_s18, %s814_s17  ;;  %p284_p4 = scmp.eq.s32.totalorder %s687_s22, 1 }
   0xb   : > { %s931_s26 = scalar_select %p265_p1, %s822_s19, %s267_s24  }
   0xc   : > { %p933_p5 = por %p278_p2, %p277_p0  ;;  %p937_p6 = por %p284_p4, %p283_p3 }
   0xd   : > { %p690_p7 = scmp.ge.s32.totalorder %s826_s20, 1  ;;  %p339_p8 = scmp.lt.s32.totalorder %s826_s20, 3 }
   0xf   : > { %p340_p9 = pnand %p690_p7, %p339_p8 }
  0x10   : > { %p378_p10 = scmp.lt.s32.totalorder (!%p340_p9), %s916_s21, 1  ;;  %s1064_s0 = sld [smem:[#allocation5_spill]] (!%p340_p9) }
  0x11   : > { %343 = sbr.rel (%p340_p9) target bundleno = 1293 (0x50d), region = 64  ;;  %s831_s30 = smov (!%p340_p9), 8  }
  0x12   : > { %s832_s16 = smov (!%p340_p9), 121   ;;  %s833_s22 = smov (!%p340_p9), 127  }
  0x13   : > { %s1065_s1 = sld [smem:[#allocation6_spill]] (!%p340_p9)  ;;  %s375_s12 = sand.u32 (!%p340_p9), 1, %s818_s18  }
  0x14   : > { %s698_s13 = sshll.u32 (!%p340_p9), %s916_s21, 6  ;;  %s615_s25 = scalar_lea.sflag (!%p340_p9), [#allocation3], %s375_s12 }
  0x16   : > { %v391_v0 = vld [vmem:[%s1051_s3] sm:$0xf]  ;;  %v828_v1 = vmov 0   ;;  %v829_v3 = vmov 0.0   ;;  %vm830_vm0 = vmmov 0   ;;  %s379_s14 = scalar_select %p378_p10, %s916_s21, 1  ;;  %v474_v28 = vlaneseq }
  0x17   : > { %762 = vset.pattern.permute.xlu0 %v828_v1  ;;  %763 = vset.pattern.permute.xlu1 %v828_v1  ;;  %v392_v2 = vld [vmem:[%s1052_s4] sm:$0xf]  ;;  %vm421_vm1 = vcmask 1041408   ;;  %vm417_vm2 = vcmask 31744   ;;  %vm466_vm3 = vcmask 1047616   ;;  %vm612_vm8 = vcmask 60416  }
  0x18   : > { %400 = vperm.xlu0 %762, %v391_v0   ;;  %705 = vmatprep.subr.bf16.mxu0 %v829_v3  ;;  %s692_s15 = sshll.u32 %s379_s14, 2  ;;  %v764_v12 = vld [vmem:[%s1053_s5] sm:$0x3f]   ;;  %v475_v30 = vshrl.u32 %v474_v28, 7 }
  0x19   : > { %711 = vmatprep.subr.bf16.mxu1 %v829_v3  ;;  %707 = vmatprep.mubr.msk.bf16.mxu0 %vm830_vm0, %v829_v3  ;;  %s381_s24 = scalar_lea.vmem %s1064_s0, %s692_s15  ;;  %v393_v21 = vld [vmem:[%s1054_s6] sm:$0xf]  ;;  %s834_s0 = smov [#allocation2]  }
  0x1a   : > { %713 = vmatprep.mubr.msk.bf16.mxu1 %vm830_vm0, %v829_v3  ;;  %v956_v5 = vld [vmem:[%s381_s24] sm:$0xf]  ;;  %v476_v32 = vsub.s32 0, %v475_v30  ;;  %s626_s24 = scalar_lea.hbm %s1059_s11, %s698_s13  ;;  %s770_s21 = sshll.u32 %s834_s0, 4  ;;  %s771_s21 = int_to_ptr.vmem [resolvable:$false] %s770_s21 }
  0x1b   : > { %v394_v22 = vld [vmem:[%s1055_s7] sm:$0xf] }
  0x1c   : > { %406 = vperm.xlu0 %762, %v392_v2   ;;  %v395_v27 = vld [vmem:[%s1056_s8] sm:$0xf] }
  0x1d   : > { %v383_v29 = vld [vmem:[%s1065_s1] sm:$0x1] }
  0x1e   : > { %v385_v31 = vld [vmem:[%s1050_s2] sm:$0x1]  ;;  %vm384_vm4 = vcmp.ne.f32.partialorder %v383_v29, 0.0 }
  0x1f   : > { %vm386_vm5 = vcmp.ne.f32.partialorder %v385_v31, 0.0  ;;  %v473_v33 = vsel %vm384_vm4, 1, %v828_v1  ;;  %v765_v53 = vld [vmem:[%s1057_s9] sm:$0x3f]  }
  0x20   : > { %v490_v34 = vsel %vm386_vm5, 1, %v828_v1  ;;  %v477_v35 = vrot.slane %v473_v33, %v476_v32  ;;  %v396_v62 = vld [vmem:[%s1058_s10] sm:$0xf] }
  0x21   : > { %v494_v36 = vrot.slane %v490_v34, %v476_v32 }
  0x22   : > { %vm478_vm6 = vcmp.eq.s32.totalorder %v477_v35, 1 }
  0x23   : > { %vm495_vm7 = vcmp.eq.s32.totalorder %v494_v36, 1 }
  0x93   : > { %v401_v4 = vpop.permute.xlu0 %400 }
  0x94   : > { %v403_v6 = vmul.f32 %v401_v4, %v956_v5 }
  0x97   : > { %v407_v7 = vpop.permute.xlu0 %406 }
  0x98   : > { %v409_v8 = vadd.f32 %v407_v7, %v403_v6 }
  0x9a   : > { %v410_v9 = vmax.f32 %v409_v8, 0.0 }
  0x9c   : > { %v411_v10 = vpack.c.bf16 %v410_v9, %v410_v9 }
  0x9e   : > { %v423_v11 = vsel %vm421_vm1, %v411_v10, 0 }
  0x9f   : > { %706 = vmatpush3.bf16.msra.mxu0 %v423_v11 }
  0xa2   : > { %708 = vmatmul.mubr.msk.bf16.vlgmr.msra.gmra.mxu0 %vm417_vm2, %v764_v12 }
 0x162   : > { %v459_v13 = vpop.f32.mrf.mxu0 }
 0x163   : > { %467 = vrot.lane.b32.xlu1 %v459_v13, %s831_s30  ;;  %v502_v39 = vrot.slane %v459_v13, 4 }
 0x164   : > { %v709_v14 = vpop.f32.mrf.mxu0 }
 0x166   : > { %v462_v15 = vpop.f32.mrf.mxu0 }
 0x167   : > { %484 = vrot.lane.b32.xlu1 %v462_v15, %s831_s30 }
 0x168   : > { %v710_v16 = vpop.f32.mrf.mxu0 }
 0x1d5   : > { %v468_v17 = vpop.permute.xlu1 %467 }
 0x1d6   : > { %v469_v18 = vsel %vm466_vm3, %v468_v17, %v459_v13 }
 0x1d7   : > { %470 = vrot.lane.b32.xlu0 %v469_v18, %s831_s30 }
 0x1d9   : > { %v485_v19 = vpop.permute.xlu1 %484 }
 0x1da   : > { %v486_v20 = vsel %vm466_vm3, %v485_v19, %v462_v15 }
 0x1db   : > { %487 = vrot.lane.b32.xlu1 %v486_v20, %s831_s30 }
 0x1df   : > { %508 = vperm.xlu1 %763, %v393_v21  }
 0x1e3   : > { %514 = vperm.xlu1 %763, %v394_v22  }
 0x249   : > { %v471_v23 = vpop.permute.xlu0 %470 }
 0x24a   : > { %v472_v24 = vsel %vm466_vm3, %v471_v23, %v459_v13 }
 0x24b   : > { %480 = vrot.lane.b32.xlu0 %v472_v24, %s832_s16 }
 0x24d   : > { %v488_v25 = vpop.permute.xlu1 %487 }
 0x24e   : > { %v489_v26 = vsel %vm466_vm3, %v488_v25, %v462_v15 }
 0x24f   : > { %497 = vrot.lane.b32.xlu0 %v489_v26, %s833_s22 }
 0x253   : > { %520 = vperm.xlu0 %762, %v395_v27  }
 0x25a   : > { %v509_v43 = vpop.permute.xlu1 %508 }
 0x25e   : > { %v515_v46 = vpop.permute.xlu1 %514 }
 0x2bd   : > { %v481_v37 = vpop.permute.xlu0 %480 }
 0x2be   : > { %v483_v38 = vsel %vm478_vm6, %v481_v37, 0.0 }
 0x2bf   : > { %v504_v42 = vadd.f32 %v502_v39, %v483_v38 }
 0x2c1   : > { %v498_v40 = vpop.permute.xlu0 %497 }
 0x2c2   : > { %v500_v41 = vsel %vm495_vm7, %v498_v40, 0.0 }
 0x2c3   : > { %v505_v44 = vadd.f32 %v504_v42, %v500_v41 }
 0x2c5   : > { %v511_v45 = vadd.f32 %v509_v43, %v505_v44 }
 0x2c7   : > { %v517_v47 = vmul.f32 %v515_v46, %v511_v45 }
 0x2ce   : > { %v521_v48 = vpop.permute.xlu0 %520 }
 0x2cf   : > { %v523_v49 = vadd.f32 %v521_v48, %v517_v47 }
 0x2d1   : > { %v524_v50 = vmax.f32 %v523_v49, 0.0 }
 0x2d3   : > { %v525_v51 = vpack.c.bf16 %v524_v50, %v524_v50 }
 0x2d5   : > { %v535_v52 = vsel %vm421_vm1, %v525_v51, 0 }
 0x2d6   : > { %712 = vmatpush3.bf16.msra.mxu1 %v535_v52 }
 0x2d9   : > { %714 = vmatmul.mubr.msk.bf16.vlgmr.msra.gmra.mxu1 %vm417_vm2, %v765_v53 }
 0x399   : > { %v571_v54 = vpop.f32.mrf.mxu1 }
 0x39a   : > { %578 = vrot.lane.b32.xlu1 %v571_v54, %s831_s30  ;;  %v601_v6 = vrot.slane %v571_v54, 4 }
 0x39b   : > { %v715_v55 = vpop.f32.mrf.mxu1 }
 0x39d   : > { %v574_v56 = vpop.f32.mrf.mxu1 }
 0x39e   : > { %589 = vrot.lane.b32.xlu0 %v574_v56, %s831_s30 }
 0x39f   : > { %v716_v57 = vpop.f32.mrf.mxu1 }
 0x40c   : > { %v579_v58 = vpop.permute.xlu1 %578 }
 0x40d   : > { %v580_v59 = vsel %vm466_vm3, %v579_v58, %v571_v54 }
 0x40e   : > { %581 = vrot.lane.b32.xlu1 %v580_v59, %s831_s30 }
 0x410   : > { %v590_v60 = vpop.permute.xlu0 %589 }
 0x411   : > { %v591_v61 = vsel %vm466_vm3, %v590_v60, %v574_v56 }
 0x412   : > { %592 = vrot.lane.b32.xlu0 %v591_v61, %s831_s30  ;;  %s691_s30 = sshll.u32 %s375_s12, 2 }
 0x416   : > { %607 = vperm.xlu0 %762, %v396_v62  }
 0x480   : > { %v582_v63 = vpop.permute.xlu1 %581 }
 0x481   : > { %v583_v0 = vsel %vm466_vm3, %v582_v63, %v571_v54 }
 0x482   : > { %585 = vrot.lane.b32.xlu1 %v583_v0, %s832_s16  ;;  %s377_s16 = scalar_lea.vmem [#allocation2], %s691_s30  ;;  %s772_s30 = scalar_lea.vmem %s771_s21, 128 }
 0x483   : > { %s628_s14 = sshll.u32 %s377_s16, 4  ;;  %s629_s14 = int_to_ptr.vmem [resolvable:$true] %s628_s14 }
 0x484   : > { %v593_v1 = vpop.permute.xlu0 %592  ;;  %s766_s29 = scalar_lea.vmem %s629_s14, 64  ;;  %p773_p0 = scmp.lt.s32.totalorder %s629_s14, %s771_s21 }
 0x485   : > { %v594_v2 = vsel %vm466_vm3, %v593_v1, %v574_v56  ;;  %p767_p11 = scmp.ne.s32.totalorder %s629_s14, %s766_s29  ;;  %p774_p1 = scmp.lt.s32.totalorder %s772_s30, %s766_s29 }
 0x486   : > { %596 = vrot.lane.b32.xlu1 %v594_v2, %s833_s22 }
 0x487   : > { %p768_p12 = pnand %p767_p11, %p933_p5  ;;  %p775_p2 = por %p774_p1, %p773_p0 }
 0x489   : > { %p769_p13 = pneg %p768_p12 }
 0x48b   : > { %p776_p3 = pnand %p775_p2, %p769_p13 }
 0x491   : > { %v608_v11 = vpop.permute.xlu0 %607 }
 0x4f4   : > { %v586_v3 = vpop.permute.xlu1 %585 }
 0x4f5   : > { %v588_v4 = vsel %vm478_vm6, %v586_v3, 0.0 }
 0x4f6   : > { %v603_v7 = vadd.f32 %v601_v6, %v588_v4 }
 0x4f8   : > { %v597_v8 = vpop.permute.xlu1 %596 }
 0x4f9   : > { %v599_v9 = vsel %vm495_vm7, %v597_v8, 0.0 }
 0x4fa   : > { %v604_v10 = vadd.f32 %v603_v7, %v599_v9 }
 0x4fc   : > { %v610_v12 = vadd.f32 %v608_v11, %v604_v10 }
 0x4fe   : > { %v611_v13 = vadd.f32 %v610_v12, %v956_v5 }
 0x500   : > { %613 = vst.msk [vmem:[%s377_s16] sm:$0xf] %vm612_vm8, %v611_v13 }
 0x501   : > { %779 = shalt.err (!%p776_p3)
}
 0x502   : > { %s780_s1 = scalar_lea.hbm %s626_s24, 64  ;;  %s784_s16 = scalar_lea.hbm %s1059_s11, 128 }
 0x503   : > { %p781_p4 = scmp.ne.s32.totalorder %s626_s24, %s780_s1  ;;  %p785_p9 = scmp.lt.s32.totalorder %s626_s24, %s1059_s11 }
 0x504   : > { %p786_p10 = scmp.lt.s32.totalorder %s784_s16, %s780_s1 }
 0x505   : > { %p782_p7 = pnand %p781_p4, %p933_p5 }
 0x506   : > { %p787_p11 = por %p786_p10, %p785_p9 }
 0x507   : > { %p783_p8 = pneg %p782_p7 }
 0x509   : > { %p788_p12 = pnand %p787_p11, %p783_p8 }
 0x50b   : > { %791 = shalt.err (!%p788_p12)
}
 0x50c   : > { %717 = dma.vmem_to_hbm [thread:$0]  (%p933_p5), %s629_s14, 64, %s626_s24, %s615_s25  }
 0x50d PF: > { %p723_p13 = scmp.ge.s32.totalorder %s826_s20, 2  ;;  %s640_s0 = sand.u32 1, %s814_s17  }
 0x50e   : > { %s641_s29 = scalar_lea.sflag [#allocation3], %s640_s0 }
 0x50f   : > { %p720_p0 = pnand %p723_p13, %p937_p6 }
 0x511   : > { %p721_p1 = pneg %p720_p0 }
 0x513   : > { %809 = dma.done.wait (%p721_p1), %s641_s29, 64  }
 0x514   : > { %811 = vsyncadd (%p721_p1), %s641_s29, 4294967232  ;;  %p21_p2 = scmp.ge.s32.totalorder %s920_s23, 4   ;;  %s1066_s17 = smov %s818_s18 }
 0x515   : > { %s1067_s18 = smov %s822_s19  ;;  %s1068_s19 = smov %s931_s26 }
 0x516   : > { %s1069_s20 = smov %s920_s23  ;;  %23 = sbr.rel (!%p21_p2) target bundleno = 6 (0x6), region = 99 }
 0x51b   :  { %646 = vsyncpa [#allocation3], 1 }
 0x51c   :  { %648 = vsyncpa [#allocation3 + $0x1], 1 }

</bundles_post_ra>
